<compile_context>
chip_gen: v7x
topology: tpu7x:2x2x1
jax: 0.10.0
libtpu: 0.0.40
codegen_flags: <defaults>
</compile_context>

<pallas_src>
import functools
import math

import jax
import jax.numpy as jnp
from jax import lax
from jax.experimental import pallas as pl
from jax.experimental.pallas import tpu as pltpu


def _round_up(x, m):
    return (x + m - 1) // m * m


# ---------------------------------------------------------------------------
# Fused: [optional elementwise mul] -> conv3x3 -> ReLU -> conv3x3
#        [-> + residual add] [-> 1x1 conv + sigmoid head]
# ---------------------------------------------------------------------------
def _double_conv_kernel(*refs, H, W, cin_p, cout_p,
                        fuse_mul, fuse_add, fuse_head):
    L = H * W
    M = W + 1          # lane margin so every 3x3 tap is an in-bounds lane slice

    idx = 0
    a_ref = refs[idx]; idx += 1
    b_ref = None
    if fuse_mul:
        b_ref = refs[idx]; idx += 1
    add_ref = None
    if fuse_add:
        add_ref = refs[idx]; idx += 1
    w1_ref, b1_ref, w2_ref, b2_ref = refs[idx:idx + 4]; idx += 4
    wo_ref = bo_ref = None
    if fuse_head:
        wo_ref, bo_ref = refs[idx:idx + 2]; idx += 2
    o_ref = refs[idx]; idx += 1
    oe_ref = None
    if fuse_head:
        oe_ref = refs[idx]; idx += 1
    ext_ref, col_ref = refs[idx], refs[idx + 1]

    cmax_p = ext_ref.shape[0]

    # Horizontal-wrap column masks, generated in-kernel (no DMA'd mask input).
    col_id = lax.broadcasted_iota(jnp.int32, (1, L), 1) % W
    left_ok = (col_id > 0).astype(jnp.float32)        # valid when reading w-1
    right_ok = (col_id < W - 1).astype(jnp.float32)   # valid when reading w+1

    # Zero ONLY the two (cmax_p, M) vertical out-of-range margins; the interior
    # is fully overwritten every grid step (no full-scratch zeroing, and no
    # program_id==0 gating which would be unsafe under megacore).
    zeros_m = jnp.zeros((cmax_p, M), jnp.float32)
    ext_ref[:, 0:M] = zeros_m
    ext_ref[:, M + L:L + 2 * M] = zeros_m

    def conv3x3(c, w_ref, bias_ref):
        # im2col: 9 lane-shifted, column-masked copies -> ONE K=9*c MXU matmul.
        for kh in range(3):
            for kw in range(3):
                t = 3 * kh + kw
                off = M + (kh - 1) * W + (kw - 1)
                tap = ext_ref[:c, off:off + L]
                if kw == 0:
                    tap = tap * left_ok
                elif kw == 2:
                    tap = tap * right_ok
                col_ref[t * c:(t + 1) * c, :] = tap
        return jnp.dot(w_ref[...], col_ref[:9 * c, :],
                       preferred_element_type=jnp.float32) + bias_ref[...]

    # Stage conv1 input: one full-width lane-dense store, elementwise product
    # (encoder * decoder_up) fused and hoisted out of any per-row loop.
    x = a_ref[0]
    if fuse_mul:
        x = x * b_ref[0]
    ext_ref[:cin_p, M:M + L] = x.astype(jnp.float32)

    y1 = jnp.maximum(conv3x3(cin_p, w1_ref, b1_ref), 0.0)
    ext_ref[:cout_p, M:M + L] = y1            # intermediate never leaves VMEM
    y2 = conv3x3(cout_p, w2_ref, b2_ref)

    out = y2
    if fuse_add:
        out = out + add_ref[0]                # fused resize(edge) + tmp_co
    o_ref[0] = out.astype(o_ref.dtype)

    if fuse_head:
        # 1x1 conv as an MXU matmul (weights padded to 8 rows), sigmoid on EUP.
        logits = jnp.dot(wo_ref[...], y2, preferred_element_type=jnp.float32)
        logits = logits[0:1, :] + bo_ref[...]
        oe_ref[0] = (1.0 / (1.0 + jnp.exp(-logits))).astype(oe_ref.dtype)


def fused_double_conv(acts, w1, b1, w2, b2, *, H, W, add=None, head=None):
    """conv3x3(pad=1) -> ReLU -> conv3x3(pad=1), fused in one pallas_call.

    acts: tuple of one or two (N, Cin, H, W) arrays; two -> multiplied in-kernel.
    w1: (Cout, Cin, 3, 3); w2: (Cout, Cout, 3, 3); b1/b2: (Cout,)
    add: optional (N, C<=Cout_p, H, W) added to the conv2 output in-kernel.
    head: optional (w_out (1, Cout, 1, 1), b_out (1,)) -> extra output
          sigmoid(conv1x1(conv2_output)).
    Returns channel-padded (N, Cout_p, H*W) [, (N, 1, H*W)] float32.
    """
    fuse_mul = len(acts) == 2
    fuse_add = add is not None
    fuse_head = head is not None

    N, cin = acts[0].shape[0], acts[0].shape[1]
    cout = w1.shape[0]
    cin_p, cout_p = _round_up(cin, 8), _round_up(cout, 8)
    cmax_p = max(cin_p, cout_p)
    L = H * W
    M = W + 1

    def pad_act(x, cp):
        n, c = x.shape[0], x.shape[1]
        x = x.reshape(n, c, L).astype(jnp.float32)
        if cp > c:
            x = jnp.pad(x, ((0, 0), (0, cp - c), (0, 0)))
        return x

    def prep_w3x3(w, co_p, ci_p):
        co, ci = w.shape[0], w.shape[1]
        w = jnp.pad(w, ((0, co_p - co), (0, ci_p - ci), (0, 0), (0, 0)))
        # (co_p, ci_p, 3, 3) -> (co_p, 3, 3, ci_p) -> (co_p, 9*ci_p); row index
        # matches the im2col row layout tap*ci_p + ci.
        return jnp.transpose(w, (0, 2, 3, 1)).reshape(co_p, 9 * ci_p).astype(jnp.float32)

    def prep_bias(b, co_p):
        return jnp.pad(b, (0, co_p - b.shape[0])).reshape(co_p, 1).astype(jnp.float32)

    in_arrays = [pad_act(a, cin_p) for a in acts]
    in_specs = [pl.BlockSpec((1, cin_p, L), lambda n: (n, 0, 0)) for _ in acts]
    if fuse_add:
        in_arrays.append(pad_act(add, cout_p))
        in_specs.append(pl.BlockSpec((1, cout_p, L), lambda n: (n, 0, 0)))
    in_arrays += [prep_w3x3(w1, cout_p, cin_p), prep_bias(b1, cout_p),
                  prep_w3x3(w2, cout_p, cout_p), prep_bias(b2, cout_p)]
    in_specs += [pl.BlockSpec((cout_p, 9 * cin_p), lambda n: (0, 0)),
                 pl.BlockSpec((cout_p, 1), lambda n: (0, 0)),
                 pl.BlockSpec((cout_p, 9 * cout_p), lambda n: (0, 0)),
                 pl.BlockSpec((cout_p, 1), lambda n: (0, 0))]

    out_shapes = [jax.ShapeDtypeStruct((N, cout_p, L), jnp.float32)]
    out_specs = [pl.BlockSpec((1, cout_p, L), lambda n: (n, 0, 0))]
    if fuse_head:
        wo, bo = head
        wo8 = jnp.zeros((8, cout_p), jnp.float32).at[0, :cout].set(
            wo.reshape(cout).astype(jnp.float32))
        in_arrays += [wo8, bo.reshape(1, 1).astype(jnp.float32)]
        in_specs += [pl.BlockSpec((8, cout_p), lambda n: (0, 0)),
                     pl.BlockSpec((1, 1), lambda n: (0, 0))]
        out_shapes.append(jax.ShapeDtypeStruct((N, 1, L), jnp.float32))
        out_specs.append(pl.BlockSpec((1, 1, L), lambda n: (n, 0, 0)))

    kernel = functools.partial(_double_conv_kernel, H=H, W=W,
                               cin_p=cin_p, cout_p=cout_p,
                               fuse_mul=fuse_mul, fuse_add=fuse_add,
                               fuse_head=fuse_head)

    # Advisory cost estimate (flops over the L valid positions).
    flops = N * 2 * L * 9 * (cin_p * cout_p + cout_p * cout_p)
    transcendentals = 0
    if fuse_head:
        flops += N * 2 * L * cout_p
        transcendentals = N * L
    bytes_accessed = (sum(int(a.size) * a.dtype.itemsize for a in in_arrays)
                      + sum(math.prod(s.shape) * 4 for s in out_shapes))

    # Explicit VMEM budget: 2x-buffered in/out blocks + scratch + slack.
    scratch_bytes = 4 * (cmax_p * (L + 2 * M) + 9 * cmax_p * L)
    block_bytes = 4 * (len(acts) * cin_p * L
                       + (cout_p * L if fuse_add else 0)
                       + cout_p * L + (L if fuse_head else 0))
    weight_bytes = 4 * (9 * cout_p * (cin_p + cout_p) + 2 * cout_p
                        + (8 * cout_p + 1 if fuse_head else 0))
    vmem_limit = int(min(max(2 * (block_bytes + weight_bytes) + scratch_bytes
                             + (4 << 20), 32 << 20), 100 << 20))

    outs = pl.pallas_call(
        kernel,
        out_shape=tuple(out_shapes),
        grid_spec=pltpu.PrefetchScalarGridSpec(
            num_scalar_prefetch=0,
            grid=(N,),                      # one grid step per batch element
            in_specs=in_specs,
            out_specs=tuple(out_specs),
            scratch_shapes=[pltpu.VMEM((cmax_p, L + 2 * M), jnp.float32),
                            pltpu.VMEM((9 * cmax_p, L), jnp.float32)]),
        compiler_params=pltpu.CompilerParams(
            dimension_semantics=("parallel",),
            vmem_limit_bytes=vmem_limit),
        cost_estimate=pl.CostEstimate(flops=flops,
                                      transcendentals=transcendentals,
                                      bytes_accessed=bytes_accessed),
    )(*in_arrays)
    if fuse_head:
        return outs[0], outs[1]
    return outs[0]


# ---------------------------------------------------------------------------
# Bilinear resize, align_corners=True (wrapper-side glue)
# ---------------------------------------------------------------------------
def _interp_matrix_ac(out_size, in_size):
    """1-D linear interpolation matrix (out_size, in_size), align_corners=True."""
    if in_size == 1:
        return jnp.ones((out_size, 1), jnp.float32)
    if out_size == 1:
        return jnp.zeros((1, in_size), jnp.float32).at[0, 0].set(1.0)
    pos = jnp.arange(out_size, dtype=jnp.float32) * ((in_size - 1) / (out_size - 1))
    i0 = jnp.clip(jnp.floor(pos), 0, in_size - 2).astype(jnp.int32)
    frac = pos - i0.astype(jnp.float32)
    rows = jnp.arange(out_size)
    m = jnp.zeros((out_size, in_size), jnp.float32)
    m = m.at[rows, i0].add(1.0 - frac)
    m = m.at[rows, i0 + 1].add(frac)
    return m


def _bilinear_resize_ac(x, out_h, out_w):
    # TODO(synk): bilinear (align_corners=True) resize stays as two tiny dense
    # interpolation matmuls on the XLA side; not worth a dedicated Pallas kernel.
    _, _, h, w = x.shape
    if (h, w) == (out_h, out_w):
        return x
    ah = _interp_matrix_ac(out_h, h)
    aw = _interp_matrix_ac(out_w, w)
    return jnp.einsum("oh,nchw,pw->ncop", ah, x, aw)


# ---------------------------------------------------------------------------
# AttenConsistency forward
# ---------------------------------------------------------------------------
def atten_consistency_forward(encoder, decoder, precoder, params):
    """AttenConsistency.forward -> (attenC, out_edge), NCHW float32."""
    N, _, H, W = encoder.shape
    cout = params["cw1"].shape[0]
    cout_p = _round_up(cout, 8)
    ph, pw = precoder.shape[2], precoder.shape[3]

    # enlayer(precoder) with the `out` head (1x1 conv + sigmoid) fused in.
    edge_p_flat, out_edge_flat = fused_double_conv(
        (precoder,),
        params["ew1"], params["eb1"], params["ew2"], params["eb2"],
        H=ph, W=pw, head=(params["ow"], params["ob"]))
    edge_p = edge_p_flat.reshape(N, cout_p, ph, pw)     # padded channels are 0
    out_edge = out_edge_flat.reshape(N, 1, ph, pw)

    # Bilinear (align_corners=True) resizes as two small interp matmuls.
    dec_up = _bilinear_resize_ac(decoder, H, W)
    edge_up_p = _bilinear_resize_ac(edge_p, H, W)

    # convlayer(encoder * dec_up), with resize(edge) + tmp_co fused into the
    # kernel epilogue: attenC comes straight out of the conv kernel.
    atten_p = fused_double_conv(
        (encoder, dec_up),
        params["cw1"], params["cb1"], params["cw2"], params["cb2"],
        H=H, W=W, add=edge_up_p)
    attenC = atten_p.reshape(N, cout_p, H, W)[:, :cout]
    return attenC, out_edge


# ---------------------------------------------------------------------------
# Params + pure-JAX reference (for the self-check)
# ---------------------------------------------------------------------------
def init_params(key, in_channel, out_channel, kernel_s=3):
    """PyTorch-default-style uniform(-1/sqrt(fan_in), 1/sqrt(fan_in)) init."""
    ks = jax.random.split(key, 10)

    def conv(kw, kb, cout, cin, k):
        bound = 1.0 / math.sqrt(cin * k * k)
        w = jax.random.uniform(kw, (cout, cin, k, k), jnp.float32, -bound, bound)
        b = jax.random.uniform(kb, (cout,), jnp.float32, -bound, bound)
        return w, b

    cw1, cb1 = conv(ks[0], ks[1], out_channel, in_channel, kernel_s)
    cw2, cb2 = conv(ks[2], ks[3], out_channel, out_channel, kernel_s)
    ew1, eb1 = conv(ks[4], ks[5], out_channel, out_channel, kernel_s)
    ew2, eb2 = conv(ks[6], ks[7], out_channel, out_channel, kernel_s)
    ow, ob = conv(ks[8], ks[9], 1, out_channel, 1)
    return {"cw1": cw1, "cb1": cb1, "cw2": cw2, "cb2": cb2,
            "ew1": ew1, "eb1": eb1, "ew2": ew2, "eb2": eb2,
            "ow": ow, "ob": ob}


def _conv2d_ref(x, w, b):
    pad = "SAME" if w.shape[-1] == 3 else "VALID"
    y = jax.lax.conv_general_dilated(x, w, (1, 1), pad,
                                     dimension_numbers=("NCHW", "OIHW", "NCHW"))
    return y + b.reshape(1, -1, 1, 1)


def _reference_forward(encoder, decoder, precoder, params):
    _, _, H, W = encoder.shape
    dec_up = _bilinear_resize_ac(decoder, H, W)
    t = _conv2d_ref(encoder * dec_up, params["cw1"], params["cb1"])
    t = jnp.maximum(t, 0.0)
    t = _conv2d_ref(t, params["cw2"], params["cb2"])
    e = _conv2d_ref(precoder, params["ew1"], params["eb1"])
    e = jnp.maximum(e, 0.0)
    e = _conv2d_ref(e, params["ew2"], params["eb2"])
    attenC = _bilinear_resize_ac(e, H, W) + t
    out_edge = 1.0 / (1.0 + jnp.exp(-_conv2d_ref(e, params["ow"], params["ob"])))
    return attenC, out_edge


if __name__ == "__main__":
    key = jax.random.PRNGKey(0)
    k_enc, k_dec, k_pre, k_par = jax.random.split(key, 4)

    N = 2
    in_channel, out_channel = 4, 8
    H = W = 16           # encoder resolution
    dh = dw = 8          # decoder resolution (upsampled to HxW in forward)
    ph = pw = 8          # precoder / edge resolution

    encoder = jax.random.normal(k_enc, (N, in_channel, H, W), jnp.float32)
    decoder = jax.random.normal(k_dec, (N, in_channel, dh, dw), jnp.float32)
    precoder = jax.random.normal(k_pre, (N, out_channel, ph, pw), jnp.float32)
    params = init_params(k_par, in_channel, out_channel)

    attenC, out_edge = atten_consistency_forward(encoder, decoder, precoder, params)
    attenC = jax.block_until_ready(attenC)
    out_edge = jax.block_until_ready(out_edge)

    ref_attenC, ref_out_edge = _reference_forward(encoder, decoder, precoder, params)
    ref_attenC = jax.block_until_ready(ref_attenC)
    ref_out_edge = jax.block_until_ready(ref_out_edge)

    assert attenC.shape == (N, out_channel, H, W), attenC.shape
    assert out_edge.shape == (N, 1, ph, pw), out_edge.shape
    err_a = float(jnp.max(jnp.abs(attenC - ref_attenC)))
    err_e = float(jnp.max(jnp.abs(out_edge - ref_out_edge)))
    assert err_a < 1e-3, err_a
    assert err_e < 1e-3, err_e

    print("KERNEL_OK")
</pallas_src>

<mosaic_0001>
module attributes {stable_mosaic.version = 11 : i64} {
  func.func @_double_conv_kernel(%arg0: i32, %arg1: memref<1x8x64xf32, #tpu.memory_space<vmem>>, %arg2: memref<8x72xf32, #tpu.memory_space<vmem>>, %arg3: memref<8x1xf32, #tpu.memory_space<vmem>>, %arg4: memref<8x72xf32, #tpu.memory_space<vmem>>, %arg5: memref<8x1xf32, #tpu.memory_space<vmem>>, %arg6: memref<8x8xf32, #tpu.memory_space<vmem>>, %arg7: memref<1x1xf32, #tpu.memory_space<vmem>>, %arg8: memref<1x8x64xf32, #tpu.memory_space<vmem>>, %arg9: memref<1x1x64xf32, #tpu.memory_space<vmem>>, %arg10: memref<8x82xf32, #tpu.memory_space<vmem>>, %arg11: memref<72x64xf32, #tpu.memory_space<vmem>>) attributes {dimension_semantics = [#tpu.dimension_semantics<parallel>], iteration_bounds = array<i64: 2>, scalar_prefetch = 0 : i64, scratch_operands = 2 : i64, tpu.core_type = #tpu.core_type<tc>, window_params = [{transform_indices = @transform_0, window_bounds = array<i64: 1, 8, 64>}, {pipeline_mode = #tpu.pipeline_mode<synchronous>, transform_indices = @transform_1, window_bounds = array<i64: 8, 72>}, {pipeline_mode = #tpu.pipeline_mode<synchronous>, transform_indices = @transform_2, window_bounds = array<i64: 8, 1>}, {pipeline_mode = #tpu.pipeline_mode<synchronous>, transform_indices = @transform_3, window_bounds = array<i64: 8, 72>}, {pipeline_mode = #tpu.pipeline_mode<synchronous>, transform_indices = @transform_4, window_bounds = array<i64: 8, 1>}, {pipeline_mode = #tpu.pipeline_mode<synchronous>, transform_indices = @transform_5, window_bounds = array<i64: 8, 8>}, {pipeline_mode = #tpu.pipeline_mode<synchronous>, transform_indices = @transform_6, window_bounds = array<i64: 1, 1>}, {transform_indices = @transform_7, window_bounds = array<i64: 1, 8, 64>}, {transform_indices = @transform_8, window_bounds = array<i64: 1, 1, 64>}]} {
    %0 = tpu.iota {dimensions = array<i32: 1>} : vector<1x64xi32>
    %c8_i32 = arith.constant 8 : i32
    %c0_i32 = arith.constant 0 : i32
    %1 = arith.cmpi eq, %c8_i32, %c0_i32 : i32
    %c1_i32 = arith.constant 1 : i32
    %2 = arith.select %1, %c1_i32, %c8_i32 : i32
    %3 = vector.broadcast %2 : i32 to vector<1x64xi32>
    %4 = arith.remsi %0, %3 : vector<1x64xi32>
    %c0_i32_0 = arith.constant 0 : i32
    %5 = vector.broadcast %c0_i32_0 : i32 to vector<1x64xi32>
    %6 = arith.cmpi ne, %4, %5 : vector<1x64xi32>
    %c0_i32_1 = arith.constant 0 : i32
    %7 = vector.broadcast %c0_i32_1 : i32 to vector<1x64xi32>
    %8 = arith.cmpi slt, %4, %7 : vector<1x64xi32>
    %c0_i32_2 = arith.constant 0 : i32
    %9 = arith.cmpi slt, %2, %c0_i32_2 : i32
    %10 = vector.broadcast %9 : i1 to vector<1x64xi1>
    %11 = vector.broadcast %10 : vector<1x64xi1> to vector<1x64xi1>
    %12 = arith.xori %8, %11 : vector<1x64xi1>
    %13 = arith.andi %12, %6 : vector<1x64xi1>
    %14 = vector.broadcast %2 : i32 to vector<1x64xi32>
    %15 = arith.addi %4, %14 : vector<1x64xi32>
    %16 = arith.select %13, %15, %4 : vector<1x64xi1>, vector<1x64xi32>
    %c0_i32_3 = arith.constant 0 : i32
    %17 = vector.broadcast %c0_i32_3 : i32 to vector<1x64xi32>
    %18 = arith.cmpi sgt, %16, %17 : vector<1x64xi32>
    %19 = arith.extui %18 : vector<1x64xi1> to vector<1x64xi32>
    %20 = arith.sitofp %19 : vector<1x64xi32> to vector<1x64xf32>
    %c7_i32 = arith.constant 7 : i32
    %21 = vector.broadcast %c7_i32 : i32 to vector<1x64xi32>
    %22 = arith.cmpi slt, %16, %21 : vector<1x64xi32>
    %23 = arith.extui %22 : vector<1x64xi1> to vector<1x64xi32>
    %24 = arith.sitofp %23 : vector<1x64xi32> to vector<1x64xf32>
    %cst = arith.constant 0.000000e+00 : f32
    %25 = vector.broadcast %cst : f32 to vector<8x9xf32>
    %c0 = arith.constant 0 : index
    %c0_4 = arith.constant 0 : index
    %26 = vector.load %arg10[%c0, %c0_4] : memref<8x82xf32, #tpu.memory_space<vmem>>, vector<8x9xf32>
    tpu.vector_store %arg10[%c0, %c0_4], %25 {strides = array<i32>} : memref<8x82xf32, #tpu.memory_space<vmem>>, vector<8x9xf32>,
    %c0_5 = arith.constant 0 : index
    %c73 = arith.constant 73 : index
    %27 = vector.load %arg10[%c0_5, %c73] : memref<8x82xf32, #tpu.memory_space<vmem>>, vector<8x9xf32>
    tpu.vector_store %arg10[%c0_5, %c73], %25 {strides = array<i32>} : memref<8x82xf32, #tpu.memory_space<vmem>>, vector<8x9xf32>,
    %c0_6 = arith.constant 0 : index
    %c0_7 = arith.constant 0 : index
    %c0_8 = arith.constant 0 : index
    %28 = vector.load %arg1[%c0_6, %c0_7, %c0_8] : memref<1x8x64xf32, #tpu.memory_space<vmem>>, vector<1x8x64xf32>
    %29 = vector.shape_cast %28 : vector<1x8x64xf32> to vector<8x64xf32>
    %c0_9 = arith.constant 0 : index
    %c9 = arith.constant 9 : index
    %30 = vector.load %arg10[%c0_9, %c9] : memref<8x82xf32, #tpu.memory_space<vmem>>, vector<8x64xf32>
    tpu.vector_store %arg10[%c0_9, %c9], %29 {strides = array<i32>} : memref<8x82xf32, #tpu.memory_space<vmem>>, vector<8x64xf32>,
    %c0_10 = arith.constant 0 : index
    %c0_11 = arith.constant 0 : index
    %31 = vector.load %arg10[%c0_10, %c0_11] : memref<8x82xf32, #tpu.memory_space<vmem>>, vector<8x64xf32>
    %32 = vector.broadcast %20 : vector<1x64xf32> to vector<8x64xf32>
    %33 = arith.mulf %31, %32 : vector<8x64xf32>
    %c0_12 = arith.constant 0 : index
    %c0_13 = arith.constant 0 : index
    %34 = vector.load %arg11[%c0_12, %c0_13] : memref<72x64xf32, #tpu.memory_space<vmem>>, vector<8x64xf32>
    tpu.vector_store %arg11[%c0_12, %c0_13], %33 {strides = array<i32>} : memref<72x64xf32, #tpu.memory_space<vmem>>, vector<8x64xf32>,
    %c0_14 = arith.constant 0 : index
    %c1 = arith.constant 1 : index
    %35 = vector.load %arg10[%c0_14, %c1] : memref<8x82xf32, #tpu.memory_space<vmem>>, vector<8x64xf32>
    %c8 = arith.constant 8 : index
    %c0_15 = arith.constant 0 : index
    %36 = vector.load %arg11[%c8, %c0_15] : memref<72x64xf32, #tpu.memory_space<vmem>>, vector<8x64xf32>
    tpu.vector_store %arg11[%c8, %c0_15], %35 {strides = array<i32>} : memref<72x64xf32, #tpu.memory_space<vmem>>, vector<8x64xf32>,
    %c0_16 = arith.constant 0 : index
    %c2 = arith.constant 2 : index
    %37 = vector.load %arg10[%c0_16, %c2] : memref<8x82xf32, #tpu.memory_space<vmem>>, vector<8x64xf32>
    %38 = vector.broadcast %24 : vector<1x64xf32> to vector<8x64xf32>
    %39 = arith.mulf %37, %38 : vector<8x64xf32>
    %c16 = arith.constant 16 : index
    %c0_17 = arith.constant 0 : index
    %40 = vector.load %arg11[%c16, %c0_17] : memref<72x64xf32, #tpu.memory_space<vmem>>, vector<8x64xf32>
    tpu.vector_store %arg11[%c16, %c0_17], %39 {strides = array<i32>} : memref<72x64xf32, #tpu.memory_space<vmem>>, vector<8x64xf32>,
    %c0_18 = arith.constant 0 : index
    %c8_19 = arith.constant 8 : index
    %41 = vector.load %arg10[%c0_18, %c8_19] : memref<8x82xf32, #tpu.memory_space<vmem>>, vector<8x64xf32>
    %42 = vector.broadcast %20 : vector<1x64xf32> to vector<8x64xf32>
    %43 = arith.mulf %41, %42 : vector<8x64xf32>
    %c24 = arith.constant 24 : index
    %c0_20 = arith.constant 0 : index
    %44 = vector.load %arg11[%c24, %c0_20] : memref<72x64xf32, #tpu.memory_space<vmem>>, vector<8x64xf32>
    tpu.vector_store %arg11[%c24, %c0_20], %43 {strides = array<i32>} : memref<72x64xf32, #tpu.memory_space<vmem>>, vector<8x64xf32>,
    %c0_21 = arith.constant 0 : index
    %c9_22 = arith.constant 9 : index
    %45 = vector.load %arg10[%c0_21, %c9_22] : memref<8x82xf32, #tpu.memory_space<vmem>>, vector<8x64xf32>
    %c32 = arith.constant 32 : index
    %c0_23 = arith.constant 0 : index
    %46 = vector.load %arg11[%c32, %c0_23] : memref<72x64xf32, #tpu.memory_space<vmem>>, vector<8x64xf32>
    tpu.vector_store %arg11[%c32, %c0_23], %45 {strides = array<i32>} : memref<72x64xf32, #tpu.memory_space<vmem>>, vector<8x64xf32>,
    %c0_24 = arith.constant 0 : index
    %c10 = arith.constant 10 : index
    %47 = vector.load %arg10[%c0_24, %c10] : memref<8x82xf32, #tpu.memory_space<vmem>>, vector<8x64xf32>
    %48 = vector.broadcast %24 : vector<1x64xf32> to vector<8x64xf32>
    %49 = arith.mulf %47, %48 : vector<8x64xf32>
    %c40 = arith.constant 40 : index
    %c0_25 = arith.constant 0 : index
    %50 = vector.load %arg11[%c40, %c0_25] : memref<72x64xf32, #tpu.memory_space<vmem>>, vector<8x64xf32>
    tpu.vector_store %arg11[%c40, %c0_25], %49 {strides = array<i32>} : memref<72x64xf32, #tpu.memory_space<vmem>>, vector<8x64xf32>,
    %c0_26 = arith.constant 0 : index
    %c16_27 = arith.constant 16 : index
    %51 = vector.load %arg10[%c0_26, %c16_27] : memref<8x82xf32, #tpu.memory_space<vmem>>, vector<8x64xf32>
    %52 = vector.broadcast %20 : vector<1x64xf32> to vector<8x64xf32>
    %53 = arith.mulf %51, %52 : vector<8x64xf32>
    %c48 = arith.constant 48 : index
    %c0_28 = arith.constant 0 : index
    %54 = vector.load %arg11[%c48, %c0_28] : memref<72x64xf32, #tpu.memory_space<vmem>>, vector<8x64xf32>
    tpu.vector_store %arg11[%c48, %c0_28], %53 {strides = array<i32>} : memref<72x64xf32, #tpu.memory_space<vmem>>, vector<8x64xf32>,
    %c0_29 = arith.constant 0 : index
    %c17 = arith.constant 17 : index
    %55 = vector.load %arg10[%c0_29, %c17] : memref<8x82xf32, #tpu.memory_space<vmem>>, vector<8x64xf32>
    %c56 = arith.constant 56 : index
    %c0_30 = arith.constant 0 : index
    %56 = vector.load %arg11[%c56, %c0_30] : memref<72x64xf32, #tpu.memory_space<vmem>>, vector<8x64xf32>
    tpu.vector_store %arg11[%c56, %c0_30], %55 {strides = array<i32>} : memref<72x64xf32, #tpu.memory_space<vmem>>, vector<8x64xf32>,
    %c0_31 = arith.constant 0 : index
    %c18 = arith.constant 18 : index
    %57 = vector.load %arg10[%c0_31, %c18] : memref<8x82xf32, #tpu.memory_space<vmem>>, vector<8x64xf32>
    %58 = vector.broadcast %24 : vector<1x64xf32> to vector<8x64xf32>
    %59 = arith.mulf %57, %58 : vector<8x64xf32>
    %c64 = arith.constant 64 : index
    %c0_32 = arith.constant 0 : index
    %60 = vector.load %arg11[%c64, %c0_32] : memref<72x64xf32, #tpu.memory_space<vmem>>, vector<8x64xf32>
    tpu.vector_store %arg11[%c64, %c0_32], %59 {strides = array<i32>} : memref<72x64xf32, #tpu.memory_space<vmem>>, vector<8x64xf32>,
    %c0_33 = arith.constant 0 : index
    %c0_34 = arith.constant 0 : index
    %61 = vector.load %arg2[%c0_33, %c0_34] : memref<8x72xf32, #tpu.memory_space<vmem>>, vector<8x72xf32>
    %c0_35 = arith.constant 0 : index
    %c0_36 = arith.constant 0 : index
    %62 = vector.load %arg11[%c0_35, %c0_36] : memref<72x64xf32, #tpu.memory_space<vmem>>, vector<72x64xf32>
    %cst_37 = arith.constant dense<0.000000e+00> : vector<8x64xf32>
    %63 = tpu.matmul %61, %62, %cst_37 {dimension_numbers = #tpu.dot_dimension_numbers<[1], [0], [0], [1], [0, 0, 1, 1], [], []>} : vector<8x72xf32>, vector<72x64xf32>, vector<8x64xf32> -> vector<8x64xf32>
    %c0_38 = arith.constant 0 : index
    %c0_39 = arith.constant 0 : index
    %64 = vector.load %arg3[%c0_38, %c0_39] : memref<8x1xf32, #tpu.memory_space<vmem>>, vector<8x1xf32>
    %65 = vector.broadcast %64 : vector<8x1xf32> to vector<8x64xf32>
    %66 = arith.addf %63, %65 : vector<8x64xf32>
    %cst_40 = arith.constant 0.000000e+00 : f32
    %67 = vector.broadcast %cst_40 : f32 to vector<8x64xf32>
    %68 = arith.maximumf %66, %67 : vector<8x64xf32>
    %c0_41 = arith.constant 0 : index
    %c9_42 = arith.constant 9 : index
    %69 = vector.load %arg10[%c0_41, %c9_42] : memref<8x82xf32, #tpu.memory_space<vmem>>, vector<8x64xf32>
    tpu.vector_store %arg10[%c0_41, %c9_42], %68 {strides = array<i32>} : memref<8x82xf32, #tpu.memory_space<vmem>>, vector<8x64xf32>,
    %c0_43 = arith.constant 0 : index
    %c0_44 = arith.constant 0 : index
    %70 = vector.load %arg10[%c0_43, %c0_44] : memref<8x82xf32, #tpu.memory_space<vmem>>, vector<8x64xf32>
    %71 = vector.broadcast %20 : vector<1x64xf32> to vector<8x64xf32>
    %72 = arith.mulf %70, %71 : vector<8x64xf32>
    %c0_45 = arith.constant 0 : index
    %c0_46 = arith.constant 0 : index
    %73 = vector.load %arg11[%c0_45, %c0_46] : memref<72x64xf32, #tpu.memory_space<vmem>>, vector<8x64xf32>
    tpu.vector_store %arg11[%c0_45, %c0_46], %72 {strides = array<i32>} : memref<72x64xf32, #tpu.memory_space<vmem>>, vector<8x64xf32>,
    %c0_47 = arith.constant 0 : index
    %c1_48 = arith.constant 1 : index
    %74 = vector.load %arg10[%c0_47, %c1_48] : memref<8x82xf32, #tpu.memory_space<vmem>>, vector<8x64xf32>
    %c8_49 = arith.constant 8 : index
    %c0_50 = arith.constant 0 : index
    %75 = vector.load %arg11[%c8_49, %c0_50] : memref<72x64xf32, #tpu.memory_space<vmem>>, vector<8x64xf32>
    tpu.vector_store %arg11[%c8_49, %c0_50], %74 {strides = array<i32>} : memref<72x64xf32, #tpu.memory_space<vmem>>, vector<8x64xf32>,
    %c0_51 = arith.constant 0 : index
    %c2_52 = arith.constant 2 : index
    %76 = vector.load %arg10[%c0_51, %c2_52] : memref<8x82xf32, #tpu.memory_space<vmem>>, vector<8x64xf32>
    %77 = vector.broadcast %24 : vector<1x64xf32> to vector<8x64xf32>
    %78 = arith.mulf %76, %77 : vector<8x64xf32>
    %c16_53 = arith.constant 16 : index
    %c0_54 = arith.constant 0 : index
    %79 = vector.load %arg11[%c16_53, %c0_54] : memref<72x64xf32, #tpu.memory_space<vmem>>, vector<8x64xf32>
    tpu.vector_store %arg11[%c16_53, %c0_54], %78 {strides = array<i32>} : memref<72x64xf32, #tpu.memory_space<vmem>>, vector<8x64xf32>,
    %c0_55 = arith.constant 0 : index
    %c8_56 = arith.constant 8 : index
    %80 = vector.load %arg10[%c0_55, %c8_56] : memref<8x82xf32, #tpu.memory_space<vmem>>, vector<8x64xf32>
    %81 = vector.broadcast %20 : vector<1x64xf32> to vector<8x64xf32>
    %82 = arith.mulf %80, %81 : vector<8x64xf32>
    %c24_57 = arith.constant 24 : index
    %c0_58 = arith.constant 0 : index
    %83 = vector.load %arg11[%c24_57, %c0_58] : memref<72x64xf32, #tpu.memory_space<vmem>>, vector<8x64xf32>
    tpu.vector_store %arg11[%c24_57, %c0_58], %82 {strides = array<i32>} : memref<72x64xf32, #tpu.memory_space<vmem>>, vector<8x64xf32>,
    %c0_59 = arith.constant 0 : index
    %c9_60 = arith.constant 9 : index
    %84 = vector.load %arg10[%c0_59, %c9_60] : memref<8x82xf32, #tpu.memory_space<vmem>>, vector<8x64xf32>
    %c32_61 = arith.constant 32 : index
    %c0_62 = arith.constant 0 : index
    %85 = vector.load %arg11[%c32_61, %c0_62] : memref<72x64xf32, #tpu.memory_space<vmem>>, vector<8x64xf32>
    tpu.vector_store %arg11[%c32_61, %c0_62], %84 {strides = array<i32>} : memref<72x64xf32, #tpu.memory_space<vmem>>, vector<8x64xf32>,
    %c0_63 = arith.constant 0 : index
    %c10_64 = arith.constant 10 : index
    %86 = vector.load %arg10[%c0_63, %c10_64] : memref<8x82xf32, #tpu.memory_space<vmem>>, vector<8x64xf32>
    %87 = vector.broadcast %24 : vector<1x64xf32> to vector<8x64xf32>
    %88 = arith.mulf %86, %87 : vector<8x64xf32>
    %c40_65 = arith.constant 40 : index
    %c0_66 = arith.constant 0 : index
    %89 = vector.load %arg11[%c40_65, %c0_66] : memref<72x64xf32, #tpu.memory_space<vmem>>, vector<8x64xf32>
    tpu.vector_store %arg11[%c40_65, %c0_66], %88 {strides = array<i32>} : memref<72x64xf32, #tpu.memory_space<vmem>>, vector<8x64xf32>,
    %c0_67 = arith.constant 0 : index
    %c16_68 = arith.constant 16 : index
    %90 = vector.load %arg10[%c0_67, %c16_68] : memref<8x82xf32, #tpu.memory_space<vmem>>, vector<8x64xf32>
    %91 = vector.broadcast %20 : vector<1x64xf32> to vector<8x64xf32>
    %92 = arith.mulf %90, %91 : vector<8x64xf32>
    %c48_69 = arith.constant 48 : index
    %c0_70 = arith.constant 0 : index
    %93 = vector.load %arg11[%c48_69, %c0_70] : memref<72x64xf32, #tpu.memory_space<vmem>>, vector<8x64xf32>
    tpu.vector_store %arg11[%c48_69, %c0_70], %92 {strides = array<i32>} : memref<72x64xf32, #tpu.memory_space<vmem>>, vector<8x64xf32>,
    %c0_71 = arith.constant 0 : index
    %c17_72 = arith.constant 17 : index
    %94 = vector.load %arg10[%c0_71, %c17_72] : memref<8x82xf32, #tpu.memory_space<vmem>>, vector<8x64xf32>
    %c56_73 = arith.constant 56 : index
    %c0_74 = arith.constant 0 : index
    %95 = vector.load %arg11[%c56_73, %c0_74] : memref<72x64xf32, #tpu.memory_space<vmem>>, vector<8x64xf32>
    tpu.vector_store %arg11[%c56_73, %c0_74], %94 {strides = array<i32>} : memref<72x64xf32, #tpu.memory_space<vmem>>, vector<8x64xf32>,
    %c0_75 = arith.constant 0 : index
    %c18_76 = arith.constant 18 : index
    %96 = vector.load %arg10[%c0_75, %c18_76] : memref<8x82xf32, #tpu.memory_space<vmem>>, vector<8x64xf32>
    %97 = vector.broadcast %24 : vector<1x64xf32> to vector<8x64xf32>
    %98 = arith.mulf %96, %97 : vector<8x64xf32>
    %c64_77 = arith.constant 64 : index
    %c0_78 = arith.constant 0 : index
    %99 = vector.load %arg11[%c64_77, %c0_78] : memref<72x64xf32, #tpu.memory_space<vmem>>, vector<8x64xf32>
    tpu.vector_store %arg11[%c64_77, %c0_78], %98 {strides = array<i32>} : memref<72x64xf32, #tpu.memory_space<vmem>>, vector<8x64xf32>,
    %c0_79 = arith.constant 0 : index
    %c0_80 = arith.constant 0 : index
    %100 = vector.load %arg4[%c0_79, %c0_80] : memref<8x72xf32, #tpu.memory_space<vmem>>, vector<8x72xf32>
    %c0_81 = arith.constant 0 : index
    %c0_82 = arith.constant 0 : index
    %101 = vector.load %arg11[%c0_81, %c0_82] : memref<72x64xf32, #tpu.memory_space<vmem>>, vector<72x64xf32>
    %cst_83 = arith.constant dense<0.000000e+00> : vector<8x64xf32>
    %102 = tpu.matmul %100, %101, %cst_83 {dimension_numbers = #tpu.dot_dimension_numbers<[1], [0], [0], [1], [0, 0, 1, 1], [], []>} : vector<8x72xf32>, vector<72x64xf32>, vector<8x64xf32> -> vector<8x64xf32>
    %c0_84 = arith.constant 0 : index
    %c0_85 = arith.constant 0 : index
    %103 = vector.load %arg5[%c0_84, %c0_85] : memref<8x1xf32, #tpu.memory_space<vmem>>, vector<8x1xf32>
    %104 = vector.broadcast %103 : vector<8x1xf32> to vector<8x64xf32>
    %105 = arith.addf %102, %104 : vector<8x64xf32>
    %c0_86 = arith.constant 0 : index
    %c0_87 = arith.constant 0 : index
    %c0_88 = arith.constant 0 : index
    %106 = vector.load %arg8[%c0_86, %c0_87, %c0_88] : memref<1x8x64xf32, #tpu.memory_space<vmem>>, vector<1x8x64xf32>
    %107 = vector.shape_cast %106 : vector<1x8x64xf32> to vector<8x64xf32>
    %108 = vector.shape_cast %105 : vector<8x64xf32> to vector<1x8x64xf32>
    tpu.vector_store %arg8[%c0_86, %c0_87, %c0_88], %108 {strides = array<i32>} : memref<1x8x64xf32, #tpu.memory_space<vmem>>, vector<1x8x64xf32>,
    %c0_89 = arith.constant 0 : index
    %c0_90 = arith.constant 0 : index
    %109 = vector.load %arg6[%c0_89, %c0_90] : memref<8x8xf32, #tpu.memory_space<vmem>>, vector<8x8xf32>
    %cst_91 = arith.constant dense<0.000000e+00> : vector<8x64xf32>
    %110 = tpu.matmul %109, %105, %cst_91 {dimension_numbers = #tpu.dot_dimension_numbers<[1], [0], [0], [1], [0, 0, 1, 1], [], []>} : vector<8x8xf32>, vector<8x64xf32>, vector<8x64xf32> -> vector<8x64xf32>
    %111 = vector.extract_strided_slice %110 {offsets = [0, 0], sizes = [1, 64], strides = [1, 1]} : vector<8x64xf32> to vector<1x64xf32>
    %c0_92 = arith.constant 0 : index
    %c0_93 = arith.constant 0 : index
    %112 = vector.load %arg7[%c0_92, %c0_93] : memref<1x1xf32, #tpu.memory_space<vmem>>, vector<1x1xf32>
    %113 = vector.broadcast %112 : vector<1x1xf32> to vector<1x64xf32>
    %114 = arith.addf %111, %113 : vector<1x64xf32>
    %cst_94 = arith.constant 0.000000e+00 : f32
    %115 = vector.broadcast %cst_94 : f32 to vector<1x64xf32>
    %116 = arith.subf %115, %114 : vector<1x64xf32>
    %117 = math.exp %116 : vector<1x64xf32>
    %cst_95 = arith.constant 1.000000e+00 : f32
    %118 = vector.broadcast %cst_95 : f32 to vector<1x64xf32>
    %119 = arith.addf %118, %117 : vector<1x64xf32>
    %cst_96 = arith.constant 1.000000e+00 : f32
    %120 = vector.broadcast %cst_96 : f32 to vector<1x64xf32>
    %121 = arith.divf %120, %119 : vector<1x64xf32>
    %c0_97 = arith.constant 0 : index
    %c0_98 = arith.constant 0 : index
    %c0_99 = arith.constant 0 : index
    %122 = vector.load %arg9[%c0_97, %c0_98, %c0_99] : memref<1x1x64xf32, #tpu.memory_space<vmem>>, vector<1x1x64xf32>
    %123 = vector.shape_cast %122 : vector<1x1x64xf32> to vector<1x64xf32>
    %124 = vector.shape_cast %121 : vector<1x64xf32> to vector<1x1x64xf32>
    tpu.vector_store %arg9[%c0_97, %c0_98, %c0_99], %124 {strides = array<i32>} : memref<1x1x64xf32, #tpu.memory_space<vmem>>, vector<1x1x64xf32>,
    return
  }
  func.func @transform_0(%arg0: i32) -> (i32, i32, i32) {
    %c0_i32 = arith.constant 0 : i32
    %c0_i32_0 = arith.constant 0 : i32
    %c0_i32_1 = arith.constant 0 : i32
    return %arg0, %c0_i32, %c0_i32_0 : i32, i32, i32
  }
  func.func @transform_1(%arg0: i32) -> (i32, i32) {
    %c0_i32 = arith.constant 0 : i32
    %c0_i32_0 = arith.constant 0 : i32
    %c0_i32_1 = arith.constant 0 : i32
    return %c0_i32, %c0_i32_0 : i32, i32
  }
  func.func @transform_2(%arg0: i32) -> (i32, i32) {
    %c0_i32 = arith.constant 0 : i32
    %c0_i32_0 = arith.constant 0 : i32
    %c0_i32_1 = arith.constant 0 : i32
    return %c0_i32, %c0_i32_0 : i32, i32
  }
  func.func @transform_3(%arg0: i32) -> (i32, i32) {
    %c0_i32 = arith.constant 0 : i32
    %c0_i32_0 = arith.constant 0 : i32
    %c0_i32_1 = arith.constant 0 : i32
    return %c0_i32, %c0_i32_0 : i32, i32
  }
  func.func @transform_4(%arg0: i32) -> (i32, i32) {
    %c0_i32 = arith.constant 0 : i32
    %c0_i32_0 = arith.constant 0 : i32
    %c0_i32_1 = arith.constant 0 : i32
    return %c0_i32, %c0_i32_0 : i32, i32
  }
  func.func @transform_5(%arg0: i32) -> (i32, i32) {
    %c0_i32 = arith.constant 0 : i32
    %c0_i32_0 = arith.constant 0 : i32
    %c0_i32_1 = arith.constant 0 : i32
    return %c0_i32, %c0_i32_0 : i32, i32
  }
  func.func @transform_6(%arg0: i32) -> (i32, i32) {
    %c0_i32 = arith.constant 0 : i32
    %c0_i32_0 = arith.constant 0 : i32
    %c0_i32_1 = arith.constant 0 : i32
    return %c0_i32, %c0_i32_0 : i32, i32
  }
  func.func @transform_7(%arg0: i32) -> (i32, i32, i32) {
    %c0_i32 = arith.constant 0 : i32
    %c0_i32_0 = arith.constant 0 : i32
    %c0_i32_1 = arith.constant 0 : i32
    return %arg0, %c0_i32, %c0_i32_0 : i32, i32, i32
  }
  func.func @transform_8(%arg0: i32) -> (i32, i32, i32) {
    %c0_i32 = arith.constant 0 : i32
    %c0_i32_0 = arith.constant 0 : i32
    %c0_i32_1 = arith.constant 0 : i32
    return %arg0, %c0_i32, %c0_i32_0 : i32, i32, i32
  }
}

</mosaic_0001>

<bundles_post_ra>
// kernel: tpu_custom_call.1
= control target key start
LH: loop header
LB: loop body
LE: loop exit
PB: predicated region body
PF: predicated region fallthrough
CT: control target
= control target key end

     0   :  { %s1447_s0 = inlined_call_operand.vmem [shape: f32[2,8,64], index: 0, kind: input, shape index: {}]   ;;  %s1448_s1 = inlined_call_operand.vmem [shape: f32[8,72], index: 1, kind: input, shape index: {}]   ;;  %s1449_s2 = inlined_call_operand.vmem [shape: f32[8,1], index: 2, kind: input, shape index: {}]   ;;  %s1450_s3 = inlined_call_operand.vmem [shape: f32[8,72], index: 3, kind: input, shape index: {}]   ;;  %s1451_s4 = inlined_call_operand.vmem [shape: f32[8,1], index: 4, kind: input, shape index: {}]   ;;  %s1452_s5 = inlined_call_operand.vmem [shape: f32[8,8], index: 5, kind: input, shape index: {}]   ;;  %s1453_s6 = inlined_call_operand.<no memory space> [shape: f32[1,1], index: 6, kind: input, shape index: {}]   ;;  %s1454_s7 = inlined_call_operand.hbm [shape: f32[2,8,64], index: 7, kind: output, shape index: {0}]   ;;  %s1455_s8 = inlined_call_operand.hbm [shape: f32[2,1,64], index: 8, kind: output, shape index: {1}]  }
   0x1   :  { %v14_v0 = vstv %s1453_s6 }
   0x2   :  { %15 = vst [vmem:[#allocation4] sm:$0x1] %v14_v0 }
   0x3   :  { %16 = vsyncpa [#allocation6], 0 }
   0x4   :  { %18 = vsyncpa [#allocation6 + $0x1], 0 }
   0x5   :  { %19 = vsyncpa [#allocation8], 0 }
   0x6   :  { %21 = vsyncpa [#allocation8 + $0x1], 0  ;;  %s1213_s29 = smov 0   ;;  %s1215_s30 = smov 0  }
   0x7   :  { %s1217_s9 = smov 0   ;;  %s1219_s10 = smov 0  }
   0x8 LB: > { %s1234_s6 = sadd.s32 4294967295, %s1143_s10   ;;  %s872_s11 = sadd.s32 4294967294, %s1143_s10   ;;  %s1143_s10 = sphi %s1219_s10, %s1461_s10   ;;  %s1139_s9 = sphi %s1217_s9, %s1460_s9   ;;  %s1135_s30 = sphi %s1215_s30, %s1459_s30   ;;  %s1131_s29 = sphi %s1213_s29, %s1458_s29  }
   0x9   : > { %s1238_s12 = sadd.s32 1, %s1143_s10   ;;  %s186_s13 = sadd.s32 1, %s1139_s9 }
   0xa   : > { %s183_s14 = ssub.s32 %s1143_s10, %s1238_s12  ;;  %p196_p0 = scmp.ne.s32.totalorder %s1139_s9, %s1135_s30 }
   0xb   : > { %p184_p1 = scmp.eq.s32.totalorder %s183_s14, 0  ;;  %p197_p2 = scmp.eq.s32.totalorder %s1234_s6, 1 }
   0xc   : > { %p202_p3 = scmp.ne.s32.totalorder %s1135_s30, %s1131_s29  ;;  %p203_p4 = scmp.eq.s32.totalorder %s872_s11, 1 }
   0xd   : > { %s1249_s15 = scalar_select %p184_p1, %s1139_s9, %s186_s13  }
   0xe   : > { %p1251_p5 = por %p197_p2, %p196_p0  ;;  %p1255_p6 = por %p203_p4, %p202_p3 }
   0xf   : > { %p875_p7 = scmp.ge.s32.totalorder %s1143_s10, 1  ;;  %p272_p8 = scmp.lt.s32.totalorder %s1143_s10, 3 }
  0x11   : > { %p273_p9 = pnand %p875_p7, %p272_p8 }
  0x12   : > { %p309_p10 = scmp.lt.s32.totalorder (!%p273_p9), %s1234_s6, 1  ;;  %v313_v1 = vlaneseq (!%p273_p9)  ;;  %vm333_vm0 = vcmask (!%p273_p9), 72704   ;;  %vm335_vm1 = vcmask (!%p273_p9), 671304   ;;  %v1145_v2 = vmov (!%p273_p9), 0.0   ;;  %s1146_s23 = smov (!%p273_p9), 9   ;;  %v428_v22 = vld [vmem:[%s1449_s2] sm:$0xff] (!%p273_p9) }
  0x13   : > { %276 = sbr.rel (%p273_p9) target bundleno = 1248 (0x4e0), region = 48  ;;  %334 = vst.msk [vmem:[#allocation2] sm:$0xff] (!%p273_p9), %vm333_vm0, %v1145_v2  ;;  %s1147_s24 = smov (!%p273_p9), 8   ;;  %vm342_vm4 = vcmask (!%p273_p9), 597064   ;;  %v1152_v9 = vmov (!%p273_p9), 0.0|0.0   ;;  %vm346_vm5 = vcmask (!%p273_p9), 523264  }
  0x14   : > { %v314_v3 = vand.u32 (!%p273_p9), 127, %v313_v1  ;;  %336 = vst.msk [vmem:[#allocation2] sm:$0xff] (!%p273_p9), %vm335_vm1, %v1145_v2  ;;  %s1148_s25 = smov (!%p273_p9), 2   ;;  %s1149_s26 = smov (!%p273_p9), 10   ;;  %957 = vmatprep.subr.bf16.mxu0 (!%p273_p9), %v1152_v9  ;;  %969 = vmatprep.subr.bf16.mxu1 (!%p273_p9), %v1152_v9  ;;  %vm1161_vm6 = vmmov (!%p273_p9), 0   ;;  %v1162_v23 = vmov (!%p273_p9), 0  }
  0x15   : > { %s1150_s27 = smov (!%p273_p9), 16   ;;  %s1151_s28 = smov (!%p273_p9), 18   ;;  %928 = vmatprep.mubr.msk.f32.mxu0 (!%p273_p9), %vm1161_vm6, %v1145_v2  ;;  %1043 = vset.pattern.permute.xlu0 (!%p273_p9), %v1162_v23  ;;  %v418_v44 = vld [vmem:[%s1448_s1] sm:$0xff] (!%p273_p9)  ;;  %vm434_vm7 = vcmask (!%p273_p9), 588800   ;;  %v735_v59 = vld [vmem:[#allocation4] sm:$0x1] (!%p273_p9) }
  0x16   : > { %v319_v4 = vand.u32 (!%p273_p9), 7, %v314_v3  ;;  %s1153_s11 = smov (!%p273_p9), 127   ;;  %s1154_s13 = smov (!%p273_p9), 126   ;;  %949 = vmatprep.mubr.msk.f32.mxu1 (!%p273_p9), %vm1161_vm6, %v1145_v2  ;;  %1044 = vset.pattern.permute.xlu1 (!%p273_p9), %v1162_v23  ;;  %v580_v60 = vld [vmem:[%s1451_s4] sm:$0xff] (!%p273_p9)  ;;  %vm661_vm8 = vcmask (!%p273_p9), 64512  }
  0x17   : > { %s1155_s14 = smov (!%p273_p9), 120   ;;  %s1158_s20 = smov (!%p273_p9), 112  }
  0x18   : > { %vm327_vm2 = vcmp.gt.s32.totalorder (!%p273_p9), %v319_v4, 0  ;;  %vm330_vm3 = vcmp.lt.s32.totalorder (!%p273_p9), %v319_v4, 7  ;;  %s1159_s21 = smov (!%p273_p9), 111  }
  0x19   : > { %v1271_v6 = vsel (!%p273_p9), %vm327_vm2, 1.0, %v1145_v2  ;;  %v879_v7 = vsel (!%p273_p9), %vm330_vm3, 1.0, %v1145_v2 }
  0x1a   : > { %s310_s18 = scalar_select %p309_p10, %s1234_s6, 1  ;;  %367 = vrot.lane.b32.xlu1 %v1271_v6, %s1147_s24 }
  0x1c   : > { %s877_s19 = sshll.u32 %s310_s18, 3  ;;  %s1156_s18 = smov 119  }
  0x1d   : > { %s312_s22 = scalar_lea.vmem %s1447_s0, %s877_s19  ;;  %s1157_s19 = smov 118  }
  0x1e   : > { %v337_v5 = vld [vmem:[%s312_s22] sm:$0xff]  ;;  %383 = vrot.lane.b32.xlu1 %v879_v7, %s1149_s26  ;;  %s1160_s22 = smov 110  }
  0x1f   : > { %339 = vrot.lane.b32.xlu0 %v337_v5, %s1146_s23 }
  0x22   : > { %409 = vrot.lane.b32.xlu1 %v879_v7, %s1151_s28 }
  0x23   : > { %356 = vrot.lane.b32.xlu0 %v879_v7, %s1148_s25 }
  0x27   : > { %393 = vrot.lane.b32.xlu0 %v1271_v6, %s1150_s27 }
  0x8c   : > { %v1279_v10 = vpop.permute.xlu1 %367 }
  0x90   : > { %v1289_v16 = vpop.permute.xlu1 %383 }
  0x91   : > { %v340_v8 = vpop.permute.xlu0 %339 }
  0x92   : > { %343 = vst.msk [vmem:[#allocation2] sm:$0xff] %vm342_vm4, %v340_v8 }
  0x94   : > { %v1298_v20 = vpop.permute.xlu1 %409 }
  0x95   : > { %v1281_v12 = vpop.permute.xlu0 %356 }
  0x99   : > { %v344_v11 = vld [vmem:[#allocation2] sm:$0xff]  ;;  %v1292_v17 = vpop.permute.xlu0 %393 }
  0x9a   : > { %v345_v13 = vmul.f32 %v1271_v6, %v344_v11  ;;  %v359_v14 = vmul.f32 %v1281_v12, %v344_v11  ;;  %350 = vrot.lane.b32.xlu0 %v344_v11, %s1153_s11  ;;  %v370_v15 = vmul.f32 %v1279_v10, %v344_v11  ;;  %v386_v18 = vmul.f32 %v1289_v16, %v344_v11 }
  0x9b   : > { %v396_v19 = vmul.f32 %v1292_v17, %v344_v11  ;;  %v412_v21 = vmul.f32 %v1298_v20, %v344_v11 }
  0x9c   : > { %361 = vrot.lane.b32.xlu1 %v359_v14, %s1154_s13  ;;  %347 = vst.msk [vmem:[#allocation3] sm:$0xff] %vm346_vm5, %v345_v13 }
  0x9e   : > { %372 = vrot.lane.b32.xlu0 %v370_v15, %s1155_s14 }
  0xa0   : > { %378 = vrot.lane.b32.xlu1 %v344_v11, %s1156_s18 }
  0xa2   : > { %388 = vrot.lane.b32.xlu0 %v386_v18, %s1157_s19 }
  0xa3   : > { %v419_v29 = vld [vmem:[#allocation3] sm:$0xff] }
  0xa4   : > { %398 = vrot.lane.b32.xlu1 %v396_v19, %s1158_s20 }
  0xa6   : > { %404 = vrot.lane.b32.xlu0 %v344_v11, %s1159_s21 }
  0xa8   : > { %414 = vrot.lane.b32.xlu1 %v412_v21, %s1160_s22 }
  0xaa   : > { %431 = vperm.xlu0 %1043, %v428_v22  }
 0x10c   : > { %v351_v24 = vpop.permute.xlu0 %350 }
 0x10d   : > { %353 = vst.msk [vmem:[#allocation3 + $0x8] sm:$0xff] %vm346_vm5, %v351_v24 }
 0x10e   : > { %v362_v25 = vpop.permute.xlu1 %361 }
 0x10f   : > { %364 = vst.msk [vmem:[#allocation3 + $0x10] sm:$0xff] %vm346_vm5, %v362_v25 }
 0x110   : > { %v373_v26 = vpop.permute.xlu0 %372 }
 0x111   : > { %375 = vst.msk [vmem:[#allocation3 + $0x18] sm:$0xff] %vm346_vm5, %v373_v26 }
 0x112   : > { %v379_v27 = vpop.permute.xlu1 %378 }
 0x113   : > { %381 = vst.msk [vmem:[#allocation3 + $0x20] sm:$0xff] %vm346_vm5, %v379_v27 }
 0x114   : > { %v389_v28 = vpop.permute.xlu0 %388  ;;  %v420_v30 = vld [vmem:[#allocation3 + $0x8] sm:$0xff] }
 0x115   : > { %391 = vst.msk [vmem:[#allocation3 + $0x28] sm:$0xff] %vm346_vm5, %v389_v28  ;;  %v958_v31 = vpack.c.bf16 %v420_v30, %v419_v29 }
 0x116   : > { %v399_v32 = vpop.permute.xlu1 %398  ;;  %v421_v34 = vld [vmem:[#allocation3 + $0x10] sm:$0xff] }
 0x117   : > { %401 = vst.msk [vmem:[#allocation3 + $0x30] sm:$0xff] %vm346_vm5, %v399_v32  ;;  %959 = vmatpush3.bf16.msra.mxu0 %v958_v31 }
 0x118   : > { %v405_v33 = vpop.permute.xlu0 %404  ;;  %960 = vmatprep.subr.bf16.mxu0 %v1152_v9  ;;  %v422_v35 = vld [vmem:[#allocation3 + $0x18] sm:$0xff] }
 0x119   : > { %407 = vst.msk [vmem:[#allocation3 + $0x38] sm:$0xff] %vm346_vm5, %v405_v33  ;;  %v961_v36 = vpack.c.bf16 %v422_v35, %v421_v34 }
 0x11a   : > { %v415_v37 = vpop.permute.xlu1 %414  ;;  %v423_v38 = vld [vmem:[#allocation3 + $0x20] sm:$0xff] }
 0x11b   : > { %417 = vst.msk [vmem:[#allocation3 + $0x40] sm:$0xff] %vm346_vm5, %v415_v37  ;;  %962 = vmatpush3.bf16.msra.mxu0 %v961_v36 }
 0x11c   : > { %963 = vmatprep.subr.bf16.mxu0 %v1152_v9  ;;  %v424_v39 = vld [vmem:[#allocation3 + $0x28] sm:$0xff] }
 0x11d   : > { %v964_v40 = vpack.c.bf16 %v424_v39, %v423_v38 }
 0x11e   : > { %v425_v41 = vld [vmem:[#allocation3 + $0x30] sm:$0xff] }
 0x11f   : > { %965 = vmatpush3.bf16.msra.mxu0 %v964_v40 }
 0x120   : > { %966 = vmatprep.subr.bf16.mxu0 %v1152_v9  ;;  %v426_v42 = vld [vmem:[#allocation3 + $0x38] sm:$0xff] }
 0x121   : > { %v967_v43 = vpack.c.bf16 %v426_v42, %v425_v41 }
 0x122   : > { %v427_v45 = vld [vmem:[#allocation3 + $0x40] sm:$0xff] }
 0x123   : > { %968 = vmatpush3.bf16.msra.mxu0 %v967_v43 }
 0x124   : > { %926 = vmatprep.subr.mxu0 %v1145_v2 }
 0x127   : > { %927 = vmatpush3.msra.mxu0 %v427_v45 }
 0x128   : > { %929 = vmatmul.mubr.msk.f32.vlgmr.msra.gmra.mrb[0].mxu0 %vm434_vm7, %v418_v44  ;;  %952 = vmatprep.subr.mxu0 %v1145_v2 }
 0x129   : > { %954 = vmatprep.mubr.msk.f32.mxu0 %vm1161_vm6, %v1145_v2  ;;  %v432_v46 = vpop.permute.xlu0 %431 }
 0x1fb   : > { %v504_v47 = vpop.f32.mrb[0].mxu0 }
 0x1fc   : > { %v505_v48 = vadd.f32 %v504_v47, %v432_v46  ;;  %v930_v49 = vpop.f32.mrb[1].mxu0 }
 0x1fe   : > { %v508_v50 = vmax.f32 %v505_v48, 0.0 }
 0x200   : > { %510 = vrot.lane.b32.xlu1 %v508_v50, %s1146_s23 }
 0x272   : > { %v511_v51 = vpop.permute.xlu1 %510 }
 0x273   : > { %513 = vst.msk [vmem:[#allocation2] sm:$0xff] %vm342_vm4, %v511_v51 }
 0x27a   : > { %v517_v52 = vld [vmem:[#allocation2] sm:$0xff] }
 0x27b   : > { %519 = vrot.lane.b32.xlu1 %v517_v52, %s1153_s11  ;;  %v524_v53 = vmul.f32 %v517_v52, %v1281_v12  ;;  %v515_v54 = vmul.f32 %v1271_v6, %v517_v52  ;;  %v531_v55 = vmul.f32 %v517_v52, %v1279_v10  ;;  %v544_v56 = vmul.f32 %v517_v52, %v1289_v16  ;;  %s1163_s11 = smov [#allocation5]  }
 0x27c   : > { %v551_v57 = vmul.f32 %v517_v52, %v1292_v17  ;;  %v564_v58 = vmul.f32 %v517_v52, %v1298_v20  ;;  %v570_v20 = vld [vmem:[%s1450_s3] sm:$0xff] }
 0x27d   : > { %526 = vrot.lane.b32.xlu0 %v524_v53, %s1154_s13  ;;  %516 = vst.msk [vmem:[#allocation3] sm:$0xff] %vm346_vm5, %v515_v54  ;;  %s1053_s13 = sshll.u32 %s1163_s11, 4  ;;  %s1054_s13 = int_to_ptr.vmem [resolvable:$false] %s1053_s13 }
 0x27f   : > { %533 = vrot.lane.b32.xlu1 %v531_v55, %s1155_s14  ;;  %s1367_s14 = sand.u32 1, %s1135_s30  }
 0x280   : > { %s755_s23 = scalar_lea.sflag [#allocation6], %s1367_s14 }
 0x281   : > { %539 = vrot.lane.b32.xlu0 %v517_v52, %s1156_s18  ;;  %s876_s18 = sshll.u32 %s1367_s14, 3 }
 0x283   : > { %546 = vrot.lane.b32.xlu1 %v544_v56, %s1157_s19 }
 0x284   : > { %v571_v4 = vld [vmem:[#allocation3] sm:$0xff] }
 0x285   : > { %553 = vrot.lane.b32.xlu0 %v551_v57, %s1158_s20 }
 0x287   : > { %559 = vrot.lane.b32.xlu1 %v517_v52, %s1159_s21  ;;  %s302_s21 = scalar_lea.vmem [#allocation5], %s876_s18  ;;  %s1055_s18 = scalar_lea.vmem %s1054_s13, 256 }
 0x288   : > { %s772_s27 = sshll.u32 %s302_s21, 4  ;;  %s773_s27 = int_to_ptr.vmem [resolvable:$true] %s772_s27 }
 0x289   : > { %566 = vrot.lane.b32.xlu0 %v564_v58, %s1160_s22  ;;  %s884_s22 = sshll.u32 %s1234_s6, 7  ;;  %s1049_s28 = scalar_lea.vmem %s773_s27, 128 }
 0x28a   : > { %s1378_s26 = scalar_lea.hbm %s1454_s7, %s884_s22  ;;  %p1050_p11 = scmp.ne.s32.totalorder %s773_s27, %s1049_s28 }
 0x28b   : > { %583 = vperm.xlu1 %1044, %v580_v60   ;;  %p1056_p0 = scmp.lt.s32.totalorder %s773_s27, %s1054_s13  ;;  %p1057_p1 = scmp.lt.s32.totalorder %s1055_s18, %s1049_s28 }
 0x28c   : > { %p1051_p12 = pnand %p1050_p11, %p1251_p5 }
 0x28d   : > { %738 = vperm.xlu0 %1043, %v735_v59   ;;  %p1058_p2 = por %p1057_p1, %p1056_p0 }
 0x28e   : > { %p1052_p13 = pneg %p1051_p12 }
 0x290   : > { %p1059_p3 = pnand %p1058_p2, %p1052_p13 }
 0x2ed   : > { %v520_v61 = vpop.permute.xlu1 %519 }
 0x2ee   : > { %522 = vst.msk [vmem:[#allocation3 + $0x8] sm:$0xff] %vm346_vm5, %v520_v61 }
 0x2ef   : > { %v527_v62 = vpop.permute.xlu0 %526 }
 0x2f0   : > { %529 = vst.msk [vmem:[#allocation3 + $0x10] sm:$0xff] %vm346_vm5, %v527_v62 }
 0x2f1   : > { %v534_v63 = vpop.permute.xlu1 %533 }
 0x2f2   : > { %536 = vst.msk [vmem:[#allocation3 + $0x18] sm:$0xff] %vm346_vm5, %v534_v63 }
 0x2f3   : > { %v540_v0 = vpop.permute.xlu0 %539 }
 0x2f4   : > { %542 = vst.msk [vmem:[#allocation3 + $0x20] sm:$0xff] %vm346_vm5, %v540_v0 }
 0x2f5   : > { %v547_v3 = vpop.permute.xlu1 %546  ;;  %v572_v5 = vld [vmem:[#allocation3 + $0x8] sm:$0xff] }
 0x2f6   : > { %549 = vst.msk [vmem:[#allocation3 + $0x28] sm:$0xff] %vm346_vm5, %v547_v3  ;;  %v970_v6 = vpack.c.bf16 %v572_v5, %v571_v4 }
 0x2f7   : > { %v554_v7 = vpop.permute.xlu0 %553  ;;  %v573_v10 = vld [vmem:[#allocation3 + $0x10] sm:$0xff] }
 0x2f8   : > { %556 = vst.msk [vmem:[#allocation3 + $0x30] sm:$0xff] %vm346_vm5, %v554_v7  ;;  %971 = vmatpush3.bf16.msra.mxu1 %v970_v6 }
 0x2f9   : > { %v560_v8 = vpop.permute.xlu1 %559  ;;  %972 = vmatprep.subr.bf16.mxu1 %v1152_v9  ;;  %v574_v11 = vld [vmem:[#allocation3 + $0x18] sm:$0xff] }
 0x2fa   : > { %562 = vst.msk [vmem:[#allocation3 + $0x38] sm:$0xff] %vm346_vm5, %v560_v8  ;;  %v973_v12 = vpack.c.bf16 %v574_v11, %v573_v10 }
 0x2fb   : > { %v567_v13 = vpop.permute.xlu0 %566  ;;  %v575_v14 = vld [vmem:[#allocation3 + $0x20] sm:$0xff] }
 0x2fc   : > { %569 = vst.msk [vmem:[#allocation3 + $0x40] sm:$0xff] %vm346_vm5, %v567_v13  ;;  %974 = vmatpush3.bf16.msra.mxu1 %v973_v12 }
 0x2fd   : > { %975 = vmatprep.subr.bf16.mxu1 %v1152_v9  ;;  %v576_v15 = vld [vmem:[#allocation3 + $0x28] sm:$0xff] }
 0x2fe   : > { %v976_v16 = vpack.c.bf16 %v576_v15, %v575_v14 }
 0x2ff   : > { %v577_v17 = vld [vmem:[#allocation3 + $0x30] sm:$0xff] }
 0x300   : > { %977 = vmatpush3.bf16.msra.mxu1 %v976_v16 }
 0x301   : > { %978 = vmatprep.subr.bf16.mxu1 %v1152_v9  ;;  %v578_v18 = vld [vmem:[#allocation3 + $0x38] sm:$0xff] }
 0x302   : > { %v979_v19 = vpack.c.bf16 %v578_v18, %v577_v17 }
 0x303   : > { %v579_v21 = vld [vmem:[#allocation3 + $0x40] sm:$0xff] }
 0x304   : > { %980 = vmatpush3.bf16.msra.mxu1 %v979_v19 }
 0x305   : > { %947 = vmatprep.subr.mxu1 %v1145_v2  ;;  %v660_v2 = vld [vmem:[%s1452_s5] sm:$0xff] }
 0x308   : > { %948 = vmatpush3.msra.mxu1 %v579_v21 }
 0x309   : > { %950 = vmatmul.mubr.msk.f32.vlgmr.msra.gmra.mrb[0].mxu1 %vm434_vm7, %v570_v20 }
 0x30a   : > { %v584_v9 = vpop.permute.xlu1 %583 }
 0x3dc   : > { %v655_v22 = vpop.f32.mrb[0].mxu1 }
 0x3dd   : > { %v656_v23 = vadd.f32 %v655_v22, %v584_v9  ;;  %v951_v24 = vpop.f32.mrb[1].mxu1 }
 0x3df   : > { %953 = vmatpush3.msra.mxu0 %v656_v23  ;;  %659 = vst.msk [vmem:[%s302_s21] sm:$0xff] %vm346_vm5, %v656_v23 }
 0x3e0   : > { %955 = vmatmul.mubr.msk.f32.vlgmr.msra.gmra.mrb[2].mxu0 %vm661_vm8, %v660_v2 }
 0x3e1   : > { %1062 = shalt.err (!%p1059_p3)
}
 0x3e2   : > { %s1063_s19 = scalar_lea.hbm %s1378_s26, 128  ;;  %s1067_s22 = scalar_lea.hbm %s1454_s7, 256 }
 0x3e3   : > { %p1064_p4 = scmp.ne.s32.totalorder %s1378_s26, %s1063_s19  ;;  %p1068_p9 = scmp.lt.u32.totalorder %s1378_s26, %s1454_s7 }
 0x3e4   : > { %p1069_p10 = scmp.lt.u32.totalorder %s1067_s22, %s1063_s19  ;;  %p1071_p12 = scmp.lt.u32.totalorder %s1063_s19, %s1378_s26 }
 0x3e5   : > { %p1065_p7 = pnand %p1064_p4, %p1251_p5 }
 0x3e6   : > { %p1070_p11 = por %p1069_p10, %p1068_p9 }
 0x3e7   : > { %p1066_p8 = pneg %p1065_p7 }
 0x3e8   : > { %p1072_p13 = por %p1071_p12, %p1070_p11 }
 0x3ea   : > { %p1073_p0 = pnand %p1072_p13, %p1066_p8 }
 0x3ec   : > { %1076 = shalt.err (!%p1073_p0)
}
 0x3ed   : > { %981 = dma.vmem_to_hbm [thread:$0]  (%p1251_p5), %s773_s27, 128, %s1378_s26, %s755_s23   ;;  %v742_v25 = vshrl.u32 %v313_v1, 7  ;;  %v739_v27 = vpop.permute.xlu0 %738  ;;  %vm752_vm9 = vcmask 516096  }
 0x3ee   : > { %s885_s28 = sshll.u32 %s1234_s6, 4  ;;  %s308_s11 = scalar_lea.vmem [#allocation7], %s1367_s14 }
 0x3ef   : > { %v743_v26 = vsub.s32 0, %v742_v25  ;;  %s785_s13 = sshll.u32 %s308_s11, 4  ;;  %s1404_s23 = scalar_lea.hbm %s1455_s8, %s885_s28  ;;  %s1406_s13 = int_to_ptr.vmem [resolvable:$true] %s785_s13 }
 0x3f0   : > { %s760_s18 = scalar_lea.sflag [#allocation8], %s1367_s14  ;;  %s1077_s19 = scalar_lea.vmem %s1406_s13, 16 }
 0x3f1   : > { %v744_v28 = vrot.slane %v739_v27, %v743_v26  ;;  %p1078_p1 = scmp.ne.s32.totalorder %s1406_s13, %s1077_s19  ;;  %s1164_s6 = smov [#allocation7]  }
 0x3f2   : > { %s1081_s20 = sshll.u32 %s1164_s6, 4  ;;  %s1082_s20 = int_to_ptr.vmem [resolvable:$false] %s1081_s20 }
 0x3f3   : > { %p1079_p2 = pnand %p1078_p1, %p1251_p5  ;;  %s1083_s21 = scalar_lea.vmem %s1082_s20, 32 }
 0x3f4   : > { %p1084_p4 = scmp.lt.s32.totalorder %s1406_s13, %s1082_s20  ;;  %p1085_p7 = scmp.lt.s32.totalorder %s1083_s21, %s1077_s19 }
 0x3f5   : > { %p1080_p3 = pneg %p1079_p2 }
 0x3f6   : > { %p1086_p8 = por %p1085_p7, %p1084_p4 }
 0x3f8   : > { %p1087_p9 = pnand %p1086_p8, %p1080_p3 }
 0x4b3   : > { %v731_v29 = vpop.f32.mrb[2].mxu0 }
 0x4b4   : > { %v745_v30 = vadd.f32 %v744_v28, %v731_v29  ;;  %v956_v31 = vpop.f32.mrb[3].mxu0 }
 0x4b6   : > { %v746_v32 = vsub.f32 0.0, %v745_v30 }
 0x4b8   : > { %v747_v33 = vmul.f32 1.442695, %v746_v32 }
 0x4ba   : > { %1045 = vpow2.f32 %v747_v33 }
 0x4c4   : > { %v1046_v34 = vpop.eup %1045 }
 0x4c5   : > { %v749_v35 = vadd.f32 1.0, %v1046_v34 }
 0x4c7   : > { %1047 = vrcp.f32 %v749_v35 }
 0x4d1   : > { %v1048_v1 = vpop.eup %1047 }
 0x4d2   : > { %753 = vst.msk [vmem:[%s308_s11] sm:$0x1] %vm752_vm9, %v1048_v1 }
 0x4d3   : > { %1090 = shalt.err (!%p1087_p9)
}
 0x4d4   : > { %s1091_s14 = scalar_lea.hbm %s1404_s23, 16  ;;  %s1095_s25 = scalar_lea.hbm %s1455_s8, 32 }
 0x4d5   : > { %p1092_p10 = scmp.ne.s32.totalorder %s1404_s23, %s1091_s14  ;;  %p1096_p13 = scmp.lt.u32.totalorder %s1404_s23, %s1455_s8 }
 0x4d6   : > { %p1097_p0 = scmp.lt.u32.totalorder %s1095_s25, %s1091_s14  ;;  %p1099_p2 = scmp.lt.u32.totalorder %s1091_s14, %s1404_s23 }
 0x4d7   : > { %p1093_p11 = pnand %p1092_p10, %p1251_p5 }
 0x4d8   : > { %p1098_p1 = por %p1097_p0, %p1096_p13 }
 0x4d9   : > { %p1094_p12 = pneg %p1093_p11 }
 0x4da   : > { %p1100_p3 = por %p1099_p2, %p1098_p1 }
 0x4dc   : > { %p1101_p4 = pnand %p1100_p3, %p1094_p12 }
 0x4de   : > { %1104 = shalt.err (!%p1101_p4)
}
 0x4df   : > { %982 = dma.vmem_to_hbm [thread:$0]  (%p1251_p5), %s1406_s13, 16, %s1404_s23, %s760_s18  }
 0x4e0 PF: > { %p992_p7 = scmp.ge.s32.totalorder %s1143_s10, 2  ;;  %s797_s26 = sand.u32 1, %s1131_s29  }
 0x4e1   : > { %s798_s27 = scalar_lea.sflag [#allocation6], %s797_s26 }
 0x4e2   : > { %p986_p8 = pnand %p992_p7, %p1255_p6 }
 0x4e4   : > { %1122 = dma.done.wait (!%p986_p8), %s798_s27, 128  }
 0x4e5   : > { %1124 = vsyncadd (!%p986_p8), %s798_s27, 4294967168  ;;  %s807_s19 = scalar_lea.sflag [#allocation8], %s797_s26 }
 0x4e6   : > { %1126 = dma.done.wait (!%p986_p8), %s807_s19, 16  }
 0x4e7   : > { %1128 = vsyncadd (!%p986_p8), %s807_s19, 4294967280  ;;  %p24_p5 = scmp.ge.s32.totalorder %s1238_s12, 4   ;;  %s1458_s29 = smov %s1135_s30 }
 0x4e8   : > { %s1459_s30 = smov %s1139_s9  ;;  %s1460_s9 = smov %s1249_s15 }
 0x4e9   : > { %s1461_s10 = smov %s1238_s12  ;;  %26 = sbr.rel (!%p24_p5) target bundleno = 8 (0x8), region = 100 }
 0x4f0   :  { %811 = vsyncpa [#allocation6], 1 }
 0x4f1   :  { %813 = vsyncpa [#allocation6 + $0x1], 1 }
 0x4f2   :  { %814 = vsyncpa [#allocation8], 1 }
 0x4f3   :  { %816 = vsyncpa [#allocation8 + $0x1], 1 }

</bundles_post_ra>
